<compile_context>
chip_gen: v7x
topology: tpu7x:2x2x1
jax: 0.10.0
libtpu: 0.0.40
codegen_flags: <defaults>
</compile_context>

<pallas_src>
import numpy as np
import jax
import jax.numpy as jnp
from jax.experimental import pallas as pl
from jax.experimental.pallas import tpu as pltpu


def _stable_softplus(x):
    return jnp.maximum(x, 0.0) + jnp.log1p(jnp.exp(-jnp.abs(x)))


def _make_gaussian_linear_kernel(stddev_prior: float):
    inv_sp2 = float(1.0 / (stddev_prior * stddev_prior))

    def kernel(x_ref, w_mu_ref, w_rho_ref, eps_w_ref,
               b_mu_ref, b_rho_ref, eps_b_ref,
               out_ref, qw_ref, pw_ref, acc_ref):
        k = pl.program_id(1)
        nk = pl.num_programs(1)

        @pl.when(k == 0)
        def _init():
            acc_ref[...] = jnp.zeros_like(acc_ref)
            qw_ref[0, 0] = 0.0
            pw_ref[0, 0] = 0.0

        w_rho = w_rho_ref[...]
        eps_w = eps_w_ref[...]
        w_sigma = _stable_softplus(w_rho)
        w = w_mu_ref[...] + w_sigma * eps_w           # reparameterized weight sample

        # Hot path: MXU matmul, accumulated over the in_dim (k) grid axis.
        acc_ref[...] += jnp.dot(x_ref[...], w, preferred_element_type=jnp.float32)

        # Log-prob partial sums (constants hoisted to the wrapper):
        #   q: -sum(sigma) - 0.5*sum(eps^2)     since (w - mu)^2 / sigma^2 == eps^2
        #   p: -0.5/sp^2 * sum(w^2)
        qw_ref[0, 0] += -jnp.sum(w_sigma) - 0.5 * jnp.sum(eps_w * eps_w)
        pw_ref[0, 0] += (-0.5 * inv_sp2) * jnp.sum(w * w)

        @pl.when(k == nk - 1)
        def _finish():
            b_rho = b_rho_ref[...]
            eps_b = eps_b_ref[...]
            b_sigma = _stable_softplus(b_rho)
            b = b_mu_ref[...] + b_sigma * eps_b       # (1, tn) — broadcast add
            out_ref[...] = (acc_ref[...] + b).astype(out_ref.dtype)
            qw_ref[0, 0] += -jnp.sum(b_sigma) - 0.5 * jnp.sum(eps_b * eps_b)
            pw_ref[0, 0] += (-0.5 * inv_sp2) * jnp.sum(b * b)

    return kernel


def _round_up(x, m):
    return (x + m - 1) // m * m


def _pick_tile(n):
    # Largest lane-dense tile that divides the padded dim; 512 keeps the double-buffered
    # footprint (3 weight tiles * 2 buffers = 6 MiB) well inside every generation's VMEM.
    for t in (512, 256, 128):
        if n % t == 0:
            return t
    return n


def gaussian_linear_forward(x, w_mu, w_rho, b_mu, b_rho, eps_w, eps_b,
                            stddev_prior: float):
    """Training-mode forward of GaussianLinear. Returns (output, q_w, p_w)."""
    batch, in_dim = x.shape
    out_dim = w_mu.shape[1]

    B = _round_up(batch, 8)
    K = _round_up(in_dim, 128)
    N = _round_up(out_dim, 128)
    tk = _pick_tile(K)
    tn = _pick_tile(N)
    nj, nk = N // tn, K // tk

    f32 = jnp.float32
    NEG = -1.0e4  # softplus(-1e4) == 0 exactly in f32 -> pads contribute 0 to every sum

    xp = jnp.zeros((B, K), f32).at[:batch, :in_dim].set(x.astype(f32))
    w_mu_p = jnp.zeros((K, N), f32).at[:in_dim, :out_dim].set(w_mu.astype(f32))
    w_rho_p = jnp.full((K, N), NEG, f32).at[:in_dim, :out_dim].set(w_rho.astype(f32))
    eps_w_p = jnp.zeros((K, N), f32).at[:in_dim, :out_dim].set(eps_w.astype(f32))
    b_mu_p = jnp.zeros((1, N), f32).at[0, :out_dim].set(b_mu.astype(f32))
    b_rho_p = jnp.full((1, N), NEG, f32).at[0, :out_dim].set(b_rho.astype(f32))
    eps_b_p = jnp.zeros((1, N), f32).at[0, :out_dim].set(eps_b.astype(f32))

    kernel = _make_gaussian_linear_kernel(stddev_prior)

    grid_spec = pltpu.PrefetchScalarGridSpec(
        num_scalar_prefetch=0,
        grid=(nj, nk),                                     # out-tiles x in-tiles (reduction last)
        in_specs=[
            pl.BlockSpec((B, tk), lambda j, k: (0, k)),    # x
            pl.BlockSpec((tk, tn), lambda j, k: (k, j)),   # w_mu
            pl.BlockSpec((tk, tn), lambda j, k: (k, j)),   # w_rho
            pl.BlockSpec((tk, tn), lambda j, k: (k, j)),   # eps_w
            pl.BlockSpec((1, tn), lambda j, k: (0, j)),    # b_mu
            pl.BlockSpec((1, tn), lambda j, k: (0, j)),    # b_rho
            pl.BlockSpec((1, tn), lambda j, k: (0, j)),    # eps_b
        ],
        out_specs=(
            pl.BlockSpec((B, tn), lambda j, k: (0, j)),    # output (lane-dense f32 tiles)
            pl.BlockSpec((1, 1), lambda j, k: (j, 0),
                         memory_space=pltpu.MemorySpace.SMEM),  # q_w partial per out-tile
            pl.BlockSpec((1, 1), lambda j, k: (j, 0),
                         memory_space=pltpu.MemorySpace.SMEM),  # p_w partial per out-tile
        ),
        scratch_shapes=[pltpu.VMEM((B, tn), jnp.float32)],      # matmul accumulator
    )

    out_p, qw_part, pw_part = pl.pallas_call(
        kernel,
        out_shape=(
            jax.ShapeDtypeStruct((B, N), f32),
            jax.ShapeDtypeStruct((nj, 1), f32),
            jax.ShapeDtypeStruct((nj, 1), f32),
        ),
        grid_spec=grid_spec,
        compiler_params=pltpu.CompilerParams(
            dimension_semantics=("parallel", "arbitrary"),
            vmem_limit_bytes=32 * 1024 * 1024,   # valid on v5e / v6e / v7x; footprint << limit
        ),
    )(xp, w_mu_p, w_rho_p, eps_w_p, b_mu_p, b_rho_p, eps_b_p)

    # Hoisted constant log-density terms (true, unpadded element counts).
    n_elem = in_dim * out_dim + out_dim
    log2pi = float(np.log(2.0 * np.pi))
    q_w = jnp.sum(qw_part) + n_elem * (-0.5 * log2pi)
    p_w = jnp.sum(pw_part) + n_elem * (-0.5 * log2pi - float(np.log(stddev_prior)))
    return out_p[:batch, :out_dim], q_w, p_w


if __name__ == "__main__":
    stddev_prior = 0.1
    log2pi = np.log(2.0 * np.pi)

    def run_case(key, batch, in_dim, out_dim):
        ks = jax.random.split(key, 7)
        x = jax.random.normal(ks[0], (batch, in_dim), dtype=jnp.float32)
        w_mu = stddev_prior * jax.random.normal(ks[1], (in_dim, out_dim), dtype=jnp.float32)
        w_rho = stddev_prior * jax.random.normal(ks[2], (in_dim, out_dim), dtype=jnp.float32)
        b_mu = stddev_prior * jax.random.normal(ks[3], (out_dim,), dtype=jnp.float32)
        b_rho = stddev_prior * jax.random.normal(ks[4], (out_dim,), dtype=jnp.float32)
        # Reparameterization noise: Normal(0, stddev_prior), as in the PyTorch forward.
        eps_w = stddev_prior * jax.random.normal(ks[5], (in_dim, out_dim), dtype=jnp.float32)
        eps_b = stddev_prior * jax.random.normal(ks[6], (out_dim,), dtype=jnp.float32)

        out, q_w, p_w = gaussian_linear_forward(
            x, w_mu, w_rho, b_mu, b_rho, eps_w, eps_b, stddev_prior)
        jax.block_until_ready((out, q_w, p_w))

        # Pure-JAX reference (un-simplified formulas, mirroring the PyTorch module).
        w_sigma = jax.nn.softplus(w_rho)
        b_sigma = jax.nn.softplus(b_rho)
        w = w_mu + w_sigma * eps_w
        b = b_mu + b_sigma * eps_b
        out_ref = x @ w + b
        q_ref = (jnp.sum(-0.5 * log2pi - w_sigma - 0.5 * (w - w_mu) ** 2 / w_sigma ** 2)
                 + jnp.sum(-0.5 * log2pi - b_sigma - 0.5 * (b - b_mu) ** 2 / b_sigma ** 2))
        p_ref = (jnp.sum(-0.5 * log2pi - np.log(stddev_prior)
                         - 0.5 * w ** 2 / stddev_prior ** 2)
                 + jnp.sum(-0.5 * log2pi - np.log(stddev_prior)
                           - 0.5 * b ** 2 / stddev_prior ** 2))

        assert np.allclose(np.asarray(out), np.asarray(out_ref), rtol=1e-4, atol=1e-4), \
            f"output mismatch for ({batch},{in_dim},{out_dim})"
        assert np.allclose(float(q_w), float(q_ref), rtol=1e-4, atol=1e-2), \
            f"q_w mismatch for ({batch},{in_dim},{out_dim})"
        assert np.allclose(float(p_w), float(p_ref), rtol=1e-4, atol=1e-2), \
            f"p_w mismatch for ({batch},{in_dim},{out_dim})"

    key = jax.random.PRNGKey(0)
    k1, k2 = jax.random.split(key)
    run_case(k1, batch=8, in_dim=32, out_dim=32)      # module-scale shape (pads to one 128 tile)
    run_case(k2, batch=16, in_dim=640, out_dim=384)   # multi-tile grid: nj=3 (parallel), nk=5

    print("KERNEL_OK")
</pallas_src>

<mosaic_0001>
module attributes {stable_mosaic.version = 11 : i64} {
  func.func @kernel(%arg0: i32, %arg1: i32, %arg2: memref<8x128xf32, #tpu.memory_space<vmem>>, %arg3: memref<128x128xf32, #tpu.memory_space<vmem>>, %arg4: memref<128x128xf32, #tpu.memory_space<vmem>>, %arg5: memref<128x128xf32, #tpu.memory_space<vmem>>, %arg6: memref<1x128xf32, #tpu.memory_space<vmem>>, %arg7: memref<1x128xf32, #tpu.memory_space<vmem>>, %arg8: memref<1x128xf32, #tpu.memory_space<vmem>>, %arg9: memref<8x128xf32, #tpu.memory_space<vmem>>, %arg10: memref<1x1xf32, #tpu.memory_space<smem>>, %arg11: memref<1x1xf32, #tpu.memory_space<smem>>, %arg12: memref<8x128xf32, #tpu.memory_space<vmem>>) attributes {dimension_semantics = [#tpu.dimension_semantics<parallel>, #tpu.dimension_semantics<arbitrary>], iteration_bounds = array<i64: 1, 1>, scalar_prefetch = 0 : i64, scratch_operands = 1 : i64, tpu.core_type = #tpu.core_type<tc>, window_params = [{transform_indices = @transform_0, window_bounds = array<i64: 8, 128>}, {transform_indices = @transform_1, window_bounds = array<i64: 128, 128>}, {transform_indices = @transform_2, window_bounds = array<i64: 128, 128>}, {transform_indices = @transform_3, window_bounds = array<i64: 128, 128>}, {transform_indices = @transform_4, window_bounds = array<i64: 1, 128>}, {transform_indices = @transform_5, window_bounds = array<i64: 1, 128>}, {transform_indices = @transform_6, window_bounds = array<i64: 1, 128>}, {transform_indices = @transform_7, window_bounds = array<i64: 8, 128>}, {transform_indices = @transform_8, window_bounds = array<i64: 1, 1>}, {transform_indices = @transform_9, window_bounds = array<i64: 1, 1>}]} {
    %c0_i32 = arith.constant 0 : i32
    %0 = arith.cmpi eq, %arg1, %c0_i32 : i32
    %1 = arith.extui %0 : i1 to i32
    %c0_i32_0 = arith.constant 0 : i32
    %2 = arith.cmpi ne, %1, %c0_i32_0 : i32
    scf.if %2 {
      %cst_30 = arith.constant 0.000000e+00 : f32
      %48 = vector.broadcast %cst_30 : f32 to vector<8x128xf32>
      %c0_31 = arith.constant 0 : index
      %c0_32 = arith.constant 0 : index
      %49 = vector.load %arg12[%c0_31, %c0_32] : memref<8x128xf32, #tpu.memory_space<vmem>>, vector<8x128xf32>
      tpu.vector_store %arg12[%c0_31, %c0_32], %48 {strides = array<i32>} : memref<8x128xf32, #tpu.memory_space<vmem>>, vector<8x128xf32>,
      %cst_33 = arith.constant 0.000000e+00 : f32
      %c0_34 = arith.constant 0 : index
      %c0_35 = arith.constant 0 : index
      %50 = memref.load %arg10[%c0_34, %c0_35] : memref<1x1xf32, #tpu.memory_space<smem>>
      memref.store %cst_33, %arg10[%c0_34, %c0_35] : memref<1x1xf32, #tpu.memory_space<smem>>
      %cst_36 = arith.constant 0.000000e+00 : f32
      %c0_37 = arith.constant 0 : index
      %c0_38 = arith.constant 0 : index
      %51 = memref.load %arg11[%c0_37, %c0_38] : memref<1x1xf32, #tpu.memory_space<smem>>
      memref.store %cst_36, %arg11[%c0_37, %c0_38] : memref<1x1xf32, #tpu.memory_space<smem>>
    } else {
    }
    %c0 = arith.constant 0 : index
    %c0_1 = arith.constant 0 : index
    %3 = vector.load %arg4[%c0, %c0_1] : memref<128x128xf32, #tpu.memory_space<vmem>>, vector<128x128xf32>
    %c0_2 = arith.constant 0 : index
    %c0_3 = arith.constant 0 : index
    %4 = vector.load %arg5[%c0_2, %c0_3] : memref<128x128xf32, #tpu.memory_space<vmem>>, vector<128x128xf32>
    %cst = arith.constant 0.000000e+00 : f32
    %5 = vector.broadcast %cst : f32 to vector<128x128xf32>
    %6 = arith.maximumf %3, %5 : vector<128x128xf32>
    %7 = math.absf %3 : vector<128x128xf32>
    %cst_4 = arith.constant 0.000000e+00 : f32
    %8 = vector.broadcast %cst_4 : f32 to vector<128x128xf32>
    %9 = arith.subf %8, %7 : vector<128x128xf32>
    %10 = math.exp %9 : vector<128x128xf32>
    %11 = math.log1p %10 : vector<128x128xf32>
    %12 = arith.addf %6, %11 : vector<128x128xf32>
    %c0_5 = arith.constant 0 : index
    %c0_6 = arith.constant 0 : index
    %13 = vector.load %arg3[%c0_5, %c0_6] : memref<128x128xf32, #tpu.memory_space<vmem>>, vector<128x128xf32>
    %14 = arith.mulf %12, %4 : vector<128x128xf32>
    %15 = arith.addf %13, %14 : vector<128x128xf32>
    %c0_7 = arith.constant 0 : index
    %c0_8 = arith.constant 0 : index
    %16 = vector.load %arg12[%c0_7, %c0_8] : memref<8x128xf32, #tpu.memory_space<vmem>>, vector<8x128xf32>
    %c0_9 = arith.constant 0 : index
    %c0_10 = arith.constant 0 : index
    %17 = vector.load %arg2[%c0_9, %c0_10] : memref<8x128xf32, #tpu.memory_space<vmem>>, vector<8x128xf32>
    %cst_11 = arith.constant dense<0.000000e+00> : vector<8x128xf32>
    %18 = tpu.matmul %17, %15, %cst_11 {dimension_numbers = #tpu.dot_dimension_numbers<[1], [0], [0], [1], [0, 0, 1, 1], [], []>} : vector<8x128xf32>, vector<128x128xf32>, vector<8x128xf32> -> vector<8x128xf32>
    %19 = arith.addf %16, %18 : vector<8x128xf32>
    %c0_12 = arith.constant 0 : index
    %c0_13 = arith.constant 0 : index
    %20 = vector.load %arg12[%c0_12, %c0_13] : memref<8x128xf32, #tpu.memory_space<vmem>>, vector<8x128xf32>
    tpu.vector_store %arg12[%c0_12, %c0_13], %19 {strides = array<i32>} : memref<8x128xf32, #tpu.memory_space<vmem>>, vector<8x128xf32>,
    %c0_14 = arith.constant 0 : index
    %c0_15 = arith.constant 0 : index
    %21 = memref.load %arg10[%c0_14, %c0_15] : memref<1x1xf32, #tpu.memory_space<smem>>
    %22 = vector.shape_cast %12 : vector<128x128xf32> to vector<1x128x128xf32>
    %cst_16 = arith.constant dense<0.000000e+00> : vector<1xf32>
    %23 = vector.multi_reduction <add>, %22, %cst_16 [1, 2] : vector<1x128x128xf32> to vector<1xf32>
    %24 = vector.shape_cast %23 : vector<1xf32> to vector<1x1x1xf32>
    %25 = vector.extract %24[0, 0, 0] : f32 from vector<1x1x1xf32>
    %cst_17 = arith.constant 0.000000e+00 : f32
    %26 = arith.subf %cst_17, %25 : f32
    %27 = arith.mulf %4, %4 : vector<128x128xf32>
    %28 = vector.shape_cast %27 : vector<128x128xf32> to vector<1x128x128xf32>
    %cst_18 = arith.constant dense<0.000000e+00> : vector<1xf32>
    %29 = vector.multi_reduction <add>, %28, %cst_18 [1, 2] : vector<1x128x128xf32> to vector<1xf32>
    %30 = vector.shape_cast %29 : vector<1xf32> to vector<1x1x1xf32>
    %31 = vector.extract %30[0, 0, 0] : f32 from vector<1x1x1xf32>
    %cst_19 = arith.constant 5.000000e-01 : f32
    %32 = arith.mulf %cst_19, %31 : f32
    %33 = arith.subf %26, %32 : f32
    %34 = arith.addf %21, %33 : f32
    %c0_20 = arith.constant 0 : index
    %c0_21 = arith.constant 0 : index
    %35 = memref.load %arg10[%c0_20, %c0_21] : memref<1x1xf32, #tpu.memory_space<smem>>
    memref.store %34, %arg10[%c0_20, %c0_21] : memref<1x1xf32, #tpu.memory_space<smem>>
    %c0_22 = arith.constant 0 : index
    %c0_23 = arith.constant 0 : index
    %36 = memref.load %arg11[%c0_22, %c0_23] : memref<1x1xf32, #tpu.memory_space<smem>>
    %37 = arith.mulf %15, %15 : vector<128x128xf32>
    %38 = vector.shape_cast %37 : vector<128x128xf32> to vector<1x128x128xf32>
    %cst_24 = arith.constant dense<0.000000e+00> : vector<1xf32>
    %39 = vector.multi_reduction <add>, %38, %cst_24 [1, 2] : vector<1x128x128xf32> to vector<1xf32>
    %40 = vector.shape_cast %39 : vector<1xf32> to vector<1x1x1xf32>
    %41 = vector.extract %40[0, 0, 0] : f32 from vector<1x1x1xf32>
    %cst_25 = arith.constant -5.000000e+01 : f32
    %42 = arith.mulf %cst_25, %41 : f32
    %43 = arith.addf %36, %42 : f32
    %c0_26 = arith.constant 0 : index
    %c0_27 = arith.constant 0 : index
    %44 = memref.load %arg11[%c0_26, %c0_27] : memref<1x1xf32, #tpu.memory_space<smem>>
    memref.store %43, %arg11[%c0_26, %c0_27] : memref<1x1xf32, #tpu.memory_space<smem>>
    %c0_i32_28 = arith.constant 0 : i32
    %45 = arith.cmpi eq, %arg1, %c0_i32_28 : i32
    %46 = arith.extui %45 : i1 to i32
    %c0_i32_29 = arith.constant 0 : i32
    %47 = arith.cmpi ne, %46, %c0_i32_29 : i32
    scf.if %47 {
      %c0_30 = arith.constant 0 : index
      %c0_31 = arith.constant 0 : index
      %48 = vector.load %arg7[%c0_30, %c0_31] : memref<1x128xf32, #tpu.memory_space<vmem>>, vector<1x128xf32>
      %c0_32 = arith.constant 0 : index
      %c0_33 = arith.constant 0 : index
      %49 = vector.load %arg8[%c0_32, %c0_33] : memref<1x128xf32, #tpu.memory_space<vmem>>, vector<1x128xf32>
      %cst_34 = arith.constant 0.000000e+00 : f32
      %50 = vector.broadcast %cst_34 : f32 to vector<1x128xf32>
      %51 = arith.maximumf %48, %50 : vector<1x128xf32>
      %52 = math.absf %48 : vector<1x128xf32>
      %cst_35 = arith.constant 0.000000e+00 : f32
      %53 = vector.broadcast %cst_35 : f32 to vector<1x128xf32>
      %54 = arith.subf %53, %52 : vector<1x128xf32>
      %55 = math.exp %54 : vector<1x128xf32>
      %56 = math.log1p %55 : vector<1x128xf32>
      %57 = arith.addf %51, %56 : vector<1x128xf32>
      %c0_36 = arith.constant 0 : index
      %c0_37 = arith.constant 0 : index
      %58 = vector.load %arg6[%c0_36, %c0_37] : memref<1x128xf32, #tpu.memory_space<vmem>>, vector<1x128xf32>
      %59 = arith.mulf %57, %49 : vector<1x128xf32>
      %60 = arith.addf %58, %59 : vector<1x128xf32>
      %c0_38 = arith.constant 0 : index
      %c0_39 = arith.constant 0 : index
      %61 = vector.load %arg12[%c0_38, %c0_39] : memref<8x128xf32, #tpu.memory_space<vmem>>, vector<8x128xf32>
      %62 = vector.broadcast %60 : vector<1x128xf32> to vector<8x128xf32>
      %63 = arith.addf %61, %62 : vector<8x128xf32>
      %c0_40 = arith.constant 0 : index
      %c0_41 = arith.constant 0 : index
      %64 = vector.load %arg9[%c0_40, %c0_41] : memref<8x128xf32, #tpu.memory_space<vmem>>, vector<8x128xf32>
      tpu.vector_store %arg9[%c0_40, %c0_41], %63 {strides = array<i32>} : memref<8x128xf32, #tpu.memory_space<vmem>>, vector<8x128xf32>,
      %c0_42 = arith.constant 0 : index
      %c0_43 = arith.constant 0 : index
      %65 = memref.load %arg10[%c0_42, %c0_43] : memref<1x1xf32, #tpu.memory_space<smem>>
      %66 = vector.shape_cast %57 : vector<1x128xf32> to vector<1x1x128xf32>
      %cst_44 = arith.constant dense<0.000000e+00> : vector<1xf32>
      %67 = vector.multi_reduction <add>, %66, %cst_44 [1, 2] : vector<1x1x128xf32> to vector<1xf32>
      %68 = vector.shape_cast %67 : vector<1xf32> to vector<1x1x1xf32>
      %69 = vector.extract %68[0, 0, 0] : f32 from vector<1x1x1xf32>
      %cst_45 = arith.constant 0.000000e+00 : f32
      %70 = arith.subf %cst_45, %69 : f32
      %71 = arith.mulf %49, %49 : vector<1x128xf32>
      %72 = vector.shape_cast %71 : vector<1x128xf32> to vector<1x1x128xf32>
      %cst_46 = arith.constant dense<0.000000e+00> : vector<1xf32>
      %73 = vector.multi_reduction <add>, %72, %cst_46 [1, 2] : vector<1x1x128xf32> to vector<1xf32>
      %74 = vector.shape_cast %73 : vector<1xf32> to vector<1x1x1xf32>
      %75 = vector.extract %74[0, 0, 0] : f32 from vector<1x1x1xf32>
      %cst_47 = arith.constant 5.000000e-01 : f32
      %76 = arith.mulf %cst_47, %75 : f32
      %77 = arith.subf %70, %76 : f32
      %78 = arith.addf %65, %77 : f32
      %c0_48 = arith.constant 0 : index
      %c0_49 = arith.constant 0 : index
      %79 = memref.load %arg10[%c0_48, %c0_49] : memref<1x1xf32, #tpu.memory_space<smem>>
      memref.store %78, %arg10[%c0_48, %c0_49] : memref<1x1xf32, #tpu.memory_space<smem>>
      %c0_50 = arith.constant 0 : index
      %c0_51 = arith.constant 0 : index
      %80 = memref.load %arg11[%c0_50, %c0_51] : memref<1x1xf32, #tpu.memory_space<smem>>
      %81 = arith.mulf %60, %60 : vector<1x128xf32>
      %82 = vector.shape_cast %81 : vector<1x128xf32> to vector<1x1x128xf32>
      %cst_52 = arith.constant dense<0.000000e+00> : vector<1xf32>
      %83 = vector.multi_reduction <add>, %82, %cst_52 [1, 2] : vector<1x1x128xf32> to vector<1xf32>
      %84 = vector.shape_cast %83 : vector<1xf32> to vector<1x1x1xf32>
      %85 = vector.extract %84[0, 0, 0] : f32 from vector<1x1x1xf32>
      %cst_53 = arith.constant -5.000000e+01 : f32
      %86 = arith.mulf %cst_53, %85 : f32
      %87 = arith.addf %80, %86 : f32
      %c0_54 = arith.constant 0 : index
      %c0_55 = arith.constant 0 : index
      %88 = memref.load %arg11[%c0_54, %c0_55] : memref<1x1xf32, #tpu.memory_space<smem>>
      memref.store %87, %arg11[%c0_54, %c0_55] : memref<1x1xf32, #tpu.memory_space<smem>>
    } else {
    }
    return
  }
  func.func @transform_0(%arg0: i32, %arg1: i32) -> (i32, i32) {
    %c0_i32 = arith.constant 0 : i32
    %c0_i32_0 = arith.constant 0 : i32
    return %c0_i32, %arg1 : i32, i32
  }
  func.func @transform_1(%arg0: i32, %arg1: i32) -> (i32, i32) {
    %c0_i32 = arith.constant 0 : i32
    return %arg1, %arg0 : i32, i32
  }
  func.func @transform_2(%arg0: i32, %arg1: i32) -> (i32, i32) {
    %c0_i32 = arith.constant 0 : i32
    return %arg1, %arg0 : i32, i32
  }
  func.func @transform_3(%arg0: i32, %arg1: i32) -> (i32, i32) {
    %c0_i32 = arith.constant 0 : i32
    return %arg1, %arg0 : i32, i32
  }
  func.func @transform_4(%arg0: i32, %arg1: i32) -> (i32, i32) {
    %c0_i32 = arith.constant 0 : i32
    %c0_i32_0 = arith.constant 0 : i32
    return %c0_i32, %arg0 : i32, i32
  }
  func.func @transform_5(%arg0: i32, %arg1: i32) -> (i32, i32) {
    %c0_i32 = arith.constant 0 : i32
    %c0_i32_0 = arith.constant 0 : i32
    return %c0_i32, %arg0 : i32, i32
  }
  func.func @transform_6(%arg0: i32, %arg1: i32) -> (i32, i32) {
    %c0_i32 = arith.constant 0 : i32
    %c0_i32_0 = arith.constant 0 : i32
    return %c0_i32, %arg0 : i32, i32
  }
  func.func @transform_7(%arg0: i32, %arg1: i32) -> (i32, i32) {
    %c0_i32 = arith.constant 0 : i32
    %c0_i32_0 = arith.constant 0 : i32
    return %c0_i32, %arg0 : i32, i32
  }
  func.func @transform_8(%arg0: i32, %arg1: i32) -> (i32, i32) {
    %c0_i32 = arith.constant 0 : i32
    %c0_i32_0 = arith.constant 0 : i32
    return %arg0, %c0_i32 : i32, i32
  }
  func.func @transform_9(%arg0: i32, %arg1: i32) -> (i32, i32) {
    %c0_i32 = arith.constant 0 : i32
    %c0_i32_0 = arith.constant 0 : i32
    return %arg0, %c0_i32 : i32, i32
  }
}

</mosaic_0001>

<bundles_post_ra>
// kernel: tpu_custom_call.1
= control target key start
LH: loop header
LB: loop body
LE: loop exit
PB: predicated region body
PF: predicated region fallthrough
CT: control target
= control target key end

     0   :  { %15 = vsyncpa [#allocation4], 0  ;;  %s1566_s0 = inlined_call_operand.hbm [shape: f32[8,128], index: 0, kind: input, shape index: {}]   ;;  %s1567_s1 = inlined_call_operand.hbm [shape: f32[128,128], index: 1, kind: input, shape index: {}]   ;;  %s1568_s2 = inlined_call_operand.hbm [shape: f32[128,128], index: 2, kind: input, shape index: {}]   ;;  %s1569_s3 = inlined_call_operand.hbm [shape: f32[128,128], index: 3, kind: input, shape index: {}]   ;;  %s1570_s4 = inlined_call_operand.vmem [shape: f32[1,128], index: 4, kind: input, shape index: {}]   ;;  %s1571_s5 = inlined_call_operand.vmem [shape: f32[1,128], index: 5, kind: input, shape index: {}]   ;;  %s1572_s6 = inlined_call_operand.vmem [shape: f32[1,128], index: 6, kind: input, shape index: {}]   ;;  %s1573_s7 = inlined_call_operand.hbm [shape: f32[8,128], index: 7, kind: output, shape index: {0}]   ;;  %s1574_s8 = inlined_call_operand.hbm [shape: f32[1,1], index: 8, kind: output, shape index: {1}]   ;;  %s1575_s9 = inlined_call_operand.hbm [shape: f32[1,1], index: 9, kind: output, shape index: {2}]  }
   0x1   :  { %16 = vsyncpa [#allocation8], 0 }
   0x2   :  { %17 = vsyncpa [#allocation11], 0 }
   0x3   :  { %18 = vsyncpa [#allocation5], 0 }
   0x4   :  { %19 = vsyncpa [#allocation6], 0 }
   0x5   :  { %20 = vsyncpa [#allocation15], 0  ;;  %s1032_s30 = smov [#allocation7]   ;;  %s890_s13 = scalar_lea.hbm %s1567_s1, 2048 }
   0x6   :  { %s36_s10 = sshll.u32 %s1032_s30, 4  ;;  %p891_p0 = scmp.ne.s32.totalorder %s1567_s1, %s890_s13  ;;  %s37_s10 = int_to_ptr.vmem [resolvable:$true] %s36_s10 }
   0x7   :  { %p894_p1 = scmp.lt.u32.totalorder %s890_s13, %s1567_s1 }
   0x9   :  { %p896_p2 = pnand %p894_p1, %p891_p0 }
   0xb   :  { %899 = shalt.err (!%p896_p2)
}
   0xc   :  { %s900_s18 = scalar_lea.vmem %s37_s10, 2048  ;;  %p905_p4 = scmp.lt.s32.totalorder %s37_s10, %s37_s10 }
   0xd   :  { %p901_p3 = scmp.ne.s32.totalorder %s37_s10, %s900_s18  ;;  %p906_p5 = scmp.lt.s32.totalorder %s900_s18, %s900_s18 }
   0xf   :  { %p907_p6 = por %p906_p5, %p905_p4 }
  0x11   :  { %p908_p7 = pnand %p907_p6, %p901_p3 }
  0x13   :  { %911 = shalt.err (!%p908_p7)
}
  0x14   :  { %s1033_s19 = smov 128   ;;  %s1034_s20 = smov 8  }
  0x15   :  { %42 = dma.hbm_to_vmem [thread:$0]  %s1567_s1, 2048, %s37_s10, [#allocation8], %s1033_s19, %s1033_s19, %s1034_s20  }
  0x16   :  { %s1035_s23 = smov [#allocation3]   ;;  %s1036_s25 = smov [#allocation9]  }
  0x17   :  { %s27_s24 = sshll.u32 %s1035_s23, 4  ;;  %s48_s26 = sshll.u32 %s1036_s25, 4  ;;  %s28_s24 = int_to_ptr.vmem [resolvable:$true] %s27_s24  ;;  %s49_s26 = int_to_ptr.vmem [resolvable:$true] %s48_s26 }
  0x18   :  { %s912_s29 = scalar_lea.hbm %s1566_s0, 128 }
  0x19   :  { %p913_p8 = scmp.ne.s32.totalorder %s1566_s0, %s912_s29  ;;  %p916_p9 = scmp.lt.u32.totalorder %s912_s29, %s1566_s0 }
  0x1b   :  { %p918_p10 = pnand %p916_p9, %p913_p8 }
  0x1d   :  { %921 = shalt.err (!%p918_p10)
}
  0x1e   :  { %s922_s1 = scalar_lea.vmem %s28_s24, 128  ;;  %p927_p12 = scmp.lt.s32.totalorder %s28_s24, %s28_s24 }
  0x1f   :  { %p923_p11 = scmp.ne.s32.totalorder %s28_s24, %s922_s1  ;;  %p928_p13 = scmp.lt.s32.totalorder %s922_s1, %s922_s1 }
  0x21   :  { %p929_p0 = por %p928_p13, %p927_p12 }
  0x23   :  { %p930_p1 = pnand %p929_p0, %p923_p11 }
  0x25   :  { %933 = shalt.err (!%p930_p1)
}
  0x26   :  { %30 = dma.hbm_to_vmem [thread:$0]  %s1566_s0, 128, %s28_s24, [#allocation4]  }
  0x27   :  { %s934_s17 = scalar_lea.hbm %s1568_s2, 2048 }
  0x28   :  { %p935_p2 = scmp.ne.s32.totalorder %s1568_s2, %s934_s17  ;;  %p938_p3 = scmp.lt.u32.totalorder %s934_s17, %s1568_s2 }
  0x2a   :  { %p940_p4 = pnand %p938_p3, %p935_p2 }
  0x2c   :  { %943 = shalt.err (!%p940_p4)
}
  0x2d   :  { %s944_s25 = scalar_lea.vmem %s49_s26, 2048  ;;  %p949_p6 = scmp.lt.s32.totalorder %s49_s26, %s49_s26 }
  0x2e   :  { %p945_p5 = scmp.ne.s32.totalorder %s49_s26, %s944_s25  ;;  %p950_p7 = scmp.lt.s32.totalorder %s944_s25, %s944_s25 }
  0x30   :  { %p951_p8 = por %p950_p7, %p949_p6 }
  0x32   :  { %p952_p9 = pnand %p951_p8, %p945_p5 }
  0x34   :  { %955 = shalt.err (!%p952_p9)
}
  0x35   :  { %54 = dma.hbm_to_vmem [thread:$0]  %s1568_s2, 2048, %s49_s26, [#allocation8], %s1033_s19, %s1033_s19, %s1034_s20  }
  0x36   :  { %s1037_s27 = smov [#allocation10]   ;;  %s956_s11 = scalar_lea.hbm %s1569_s3, 2048 }
  0x37   :  { %s60_s28 = sshll.u32 %s1037_s27, 4  ;;  %p957_p10 = scmp.ne.s32.totalorder %s1569_s3, %s956_s11  ;;  %s61_s28 = int_to_ptr.vmem [resolvable:$true] %s60_s28 }
  0x38   :  { %p960_p11 = scmp.lt.u32.totalorder %s956_s11, %s1569_s3 }
  0x3a   :  { %p962_p12 = pnand %p960_p11, %p957_p10 }
  0x3c   :  { %965 = shalt.err (!%p962_p12)
}
  0x3d   :  { %s966_s14 = scalar_lea.vmem %s61_s28, 2048  ;;  %p971_p0 = scmp.lt.s32.totalorder %s61_s28, %s61_s28 }
  0x3e   :  { %p967_p13 = scmp.ne.s32.totalorder %s61_s28, %s966_s14  ;;  %p972_p1 = scmp.lt.s32.totalorder %s966_s14, %s966_s14 }
  0x40   :  { %p973_p2 = por %p972_p1, %p971_p0 }
  0x42   :  { %p974_p3 = pnand %p973_p2, %p967_p13 }
  0x44   :  { %977 = shalt.err (!%p974_p3)
}
  0x45   :  { %66 = dma.hbm_to_vmem [thread:$0]  %s1569_s3, 2048, %s61_s28, [#allocation11], %s1033_s19, %s1033_s19, %s1034_s20  }
  0x46   :  { %1020 = dma.done.wait [#allocation4], 128  }
  0x47   :  { %1021 = vsyncadd [#allocation4], 4294967168 }
  0x48   :  { %1022 = dma.done.wait [#allocation8], 4096  }
  0x49   :  { %1023 = vsyncadd [#allocation8], 4294963200 }
  0x4a   :  { %1024 = dma.done.wait [#allocation11], 2048  }
  0x4b   :  { %1025 = vsyncadd [#allocation11], 4294965248  ;;  %v1038_v0 = vmov 0.0|0.0   ;;  %vm1039_vm0 = vmmov 0   ;;  %v1040_v1 = vmov 0.0   ;;  %v1152_v2 = vld [vmem:[#allocation9] sm:$0xff] }
  0x4c   :  { %773 = vmatprep.subr.bf16.mxu0 %v1038_v0  ;;  %770 = vmatprep.mubr.msk.f32.mxu0 %vm1039_vm0, %v1040_v1  ;;  %v1154_v3 = vld [vmem:[#allocation9 + $0x8] sm:$0xff]  ;;  %v1156_v4 = vld [vmem:[#allocation10] sm:$0xff]  ;;  %v142_v6 = vand.u32 2147483647, %v1152_v2  ;;  %v1166_v10 = vld [vmem:[#allocation9 + $0x10] sm:$0xff]  ;;  %v126_v51 = vmax.f32 %v1152_v2, 0.0 }
  0x4d   :  { %v1158_v5 = vld [vmem:[#allocation10 + $0x8] sm:$0xff]  ;;  %v514_v7 = vmul.f32 %v1156_v4, %v1156_v4  ;;  %v143_v8 = vand.u32 2147483647, %v1154_v3  ;;  %v1168_v11 = vld [vmem:[#allocation9 + $0x18] sm:$0xff]  ;;  %v144_v14 = vand.u32 2147483647, %v1166_v10 }
  0x4e   :  { %v515_v9 = vmul.f32 %v1158_v5, %v1158_v5  ;;  %v158_v12 = vsub.f32 0.0, %v142_v6  ;;  %v145_v15 = vand.u32 2147483647, %v1168_v11  ;;  %v1172_v18 = vld [vmem:[#allocation10 + $0x10] sm:$0xff]  ;;  %v1174_v19 = vld [vmem:[#allocation9 + $0x20] sm:$0xff]  ;;  %v1176_v20 = vld [vmem:[#allocation9 + $0x28] sm:$0xff] }
  0x4f   :  { %v159_v13 = vsub.f32 0.0, %v143_v8  ;;  %v160_v22 = vsub.f32 0.0, %v144_v14  ;;  %v516_v24 = vmul.f32 %v1172_v18, %v1172_v18  ;;  %v146_v25 = vand.u32 2147483647, %v1174_v19  ;;  %v1181_v26 = vld [vmem:[#allocation9 + $0x30] sm:$0xff]  ;;  %v1184_v30 = vld [vmem:[#allocation10 + $0x18] sm:$0xff] }
  0x50   :  { %v174_v16 = vmul.f32 1.442695, %v158_v12  ;;  %v530_v17 = vadd.f32 %v515_v9, %v514_v7  ;;  %v161_v23 = vsub.f32 0.0, %v145_v15  ;;  %v147_v29 = vand.u32 2147483647, %v1176_v20  ;;  %v1186_v32 = vld [vmem:[#allocation9 + $0x38] sm:$0xff] }
  0x51   :  { %v176_v21 = vmul.f32 1.442695, %v159_v13  ;;  %v178_v27 = vmul.f32 1.442695, %v160_v22  ;;  %v162_v31 = vsub.f32 0.0, %v146_v25  ;;  %v517_v33 = vmul.f32 %v1184_v30, %v1184_v30  ;;  %v1192_v40 = vld [vmem:[#allocation10 + $0x20] sm:$0xff] }
  0x52   :  { %822 = vpow2.f32 %v174_v16  ;;  %v180_v28 = vmul.f32 1.442695, %v161_v23  ;;  %v531_v34 = vadd.f32 %v530_v17, %v516_v24  ;;  %v163_v35 = vsub.f32 0.0, %v147_v29  ;;  %v1194_v42 = vld [vmem:[#allocation9 + $0x40] sm:$0xff]  ;;  %v1198_v48 = vld [vmem:[#allocation9 + $0x48] sm:$0xff]  ;;  %v1213_v14 = vld [vmem:[#allocation10 + $0x30] sm:$0xff] }
  0x53   :  { %824 = vpow2.f32 %v176_v21  ;;  %v182_v36 = vmul.f32 1.442695, %v162_v31  ;;  %v148_v37 = vand.u32 2147483647, %v1181_v26  ;;  %v149_v39 = vand.u32 2147483647, %v1186_v32 }
  0x54   :  { %826 = vpow2.f32 %v178_v27  ;;  %v184_v38 = vmul.f32 1.442695, %v163_v35  ;;  %v532_v43 = vadd.f32 %v531_v34, %v517_v33  ;;  %v518_v44 = vmul.f32 %v1192_v40, %v1192_v40  ;;  %v1204_v54 = vld [vmem:[#allocation10 + $0x28] sm:$0xff]  ;;  %s1041_s27 = smov [#allocation12]  }
  0x55   :  { %828 = vpow2.f32 %v180_v28  ;;  %v164_v41 = vsub.f32 0.0, %v148_v37  ;;  %v165_v45 = vsub.f32 0.0, %v149_v39  ;;  %v150_v49 = vand.u32 2147483647, %v1194_v42  ;;  %s685_s28 = sshll.u32 %s1041_s27, 4  ;;  %s686_s28 = int_to_ptr.vmem [resolvable:$true] %s685_s28 }
  0x56   :  { %830 = vpow2.f32 %v182_v36  ;;  %v127_v52 = vmax.f32 %v1154_v3, 0.0  ;;  %v128_v53 = vmax.f32 %v1166_v10, 0.0  ;;  %v519_v57 = vmul.f32 %v1204_v54, %v1204_v54  ;;  %s978_s1 = scalar_lea.vmem %s686_s28, 128  ;;  %p983_p5 = scmp.lt.s32.totalorder %s686_s28, %s686_s28 }
  0x57   :  { %832 = vpow2.f32 %v184_v38  ;;  %v186_v46 = vmul.f32 1.442695, %v164_v41  ;;  %v188_v47 = vmul.f32 1.442695, %v165_v45  ;;  %v533_v58 = vadd.f32 %v532_v43, %v518_v44  ;;  %p979_p4 = scmp.ne.s32.totalorder %s686_s28, %s978_s1  ;;  %p984_p6 = scmp.lt.s32.totalorder %s978_s1, %s978_s1 }
  0x58   :  { %v129_v60 = vmax.f32 %v1168_v11, 0.0  ;;  %v130_v61 = vmax.f32 %v1174_v19, 0.0  ;;  %v151_v62 = vand.u32 2147483647, %v1198_v48  ;;  %v131_v1 = vmax.f32 %v1176_v20, 0.0 }
  0x59   :  { %834 = vpow2.f32 %v186_v46  ;;  %v132_v6 = vmax.f32 %v1181_v26, 0.0  ;;  %v166_v7 = vsub.f32 0.0, %v150_v49  ;;  %v1215_v16 = vadd.f32 %v533_v58, %v519_v57  ;;  %p985_p7 = por %p984_p6, %p983_p5 }
  0x5a   :  { %836 = vpow2.f32 %v188_v47  ;;  %v133_v17 = vmax.f32 %v1186_v32, 0.0  ;;  %v1220_v21 = vmul.f32 %v1213_v14, %v1213_v14  ;;  %v167_v25 = vsub.f32 0.0, %v151_v62 }
  0x5b   :  { %v190_v36 = vmul.f32 1.442695, %v166_v7  ;;  %p986_p8 = pnand %p985_p7, %p979_p4 }
  0x5c   :  { %v823_v50 = vpop.eup %822  ;;  %v192_v46 = vmul.f32 1.442695, %v167_v25 }
  0x5d   :  { %v825_v55 = vpop.eup %824  ;;  %v206_v56 = vadd.f32 1.0, %v823_v50  ;;  %v209_v9 = vmul.f32 -0.5, %v823_v50  ;;  %v212_v23 = vand.u32 2147483647, %v823_v50 }
  0x5e   :  { %v215_v59 = vadd.f32 1.0, %v825_v55  ;;  %v827_v63 = vpop.eup %826  ;;  %v218_v12 = vmul.f32 -0.5, %v825_v55  ;;  %v221_v28 = vand.u32 2147483647, %v825_v55 }
  0x5f   :  { %838 = vlog2.f32 %v206_v56  ;;  %v829_v8 = vpop.eup %828  ;;  %v224_v13 = vadd.f32 1.0, %v827_v63  ;;  %v227_v24 = vmul.f32 -0.5, %v827_v63  ;;  %v210_v33 = vadd.f32 1.0, %v209_v9 }
  0x60   :  { %840 = vlog2.f32 %v215_v59  ;;  %v233_v15 = vadd.f32 1.0, %v829_v8  ;;  %v831_v22 = vpop.eup %830  ;;  %v236_v29 = vmul.f32 -0.5, %v829_v8  ;;  %v219_v34 = vadd.f32 1.0, %v218_v12 }
  0x61   :  { %842 = vlog2.f32 %v224_v13  ;;  %v1222_v27 = vpop.eup %832  ;;  %v242_v31 = vadd.f32 1.0, %v831_v22  ;;  %v245_v35 = vmul.f32 -0.5, %v831_v22  ;;  %v230_v37 = vand.u32 2147483647, %v827_v63 }
  0x62   :  { %844 = vlog2.f32 %v233_v15  ;;  %v239_v38 = vand.u32 2147483647, %v829_v8  ;;  %v251_v39 = vadd.f32 1.0, %v1222_v27  ;;  %vm1227_vm1 = vcmp.lt.f32.partialorder %v212_v23, 0.0004427343 }
  0x63   :  { %846 = vlog2.f32 %v242_v31  ;;  %v1225_v41 = vpop.eup %834  ;;  %v228_v44 = vadd.f32 1.0, %v227_v24  ;;  %v254_v45 = vmul.f32 -0.5, %v1222_v27  ;;  %v237_v49 = vadd.f32 1.0, %v236_v29  ;;  %v117_v31 = vld [vmem:[#allocation10 + $0x38] sm:$0xff] }
  0x64   :  { %v1232_v47 = vpop.eup %836  ;;  %v248_v56 = vand.u32 2147483647, %v831_v22  ;;  %848 = vlog2.f32 %v251_v39  ;;  %v260_v57 = vadd.f32 1.0, %v1225_v41  ;;  %v211_v58 = vmul.f32 %v823_v50, %v210_v33 }
  0x65   :  { %vm1235_vm2 = vcmp.lt.f32.partialorder %v221_v28, 0.0004427343  ;;  %v246_v62 = vadd.f32 1.0, %v245_v35  ;;  %v269_v7 = vadd.f32 1.0, %v1232_v47  ;;  %v220_v12 = vmul.f32 %v825_v55, %v219_v34 }
  0x66   :  { %vm1240_vm3 = vcmp.lt.f32.partialorder %v230_v37, 0.0004427343  ;;  %vm1244_vm4 = vcmp.lt.f32.partialorder %v239_v38, 0.0004427343  ;;  %850 = vlog2.f32 %v260_v57  ;;  %v229_v24 = vmul.f32 %v827_v63, %v228_v44 }
  0x67   :  { %v255_v25 = vadd.f32 1.0, %v254_v45  ;;  %852 = vlog2.f32 %v269_v7  ;;  %v238_v29 = vmul.f32 %v829_v8, %v237_v49  ;;  %vm1248_vm5 = vcmp.lt.f32.partialorder %v248_v56, 0.0004427343  ;;  %v366_v49 = vld [vmem:[#allocation7] sm:$0xff] }
  0x68   :  { %v263_v55 = vmul.f32 -0.5, %v1225_v41  ;;  %v247_v35 = vmul.f32 %v831_v22, %v246_v62  ;;  %v257_v37 = vand.u32 2147483647, %v1222_v27  ;;  %v272_v38 = vmul.f32 -0.5, %v1232_v47 }
  0x69   :  { %v839_v9 = vpop.eup %838  ;;  %854 = vpow2.f32 %v190_v36  ;;  %v256_v22 = vmul.f32 %v1222_v27, %v255_v25  ;;  %v266_v56 = vand.u32 2147483647, %v1225_v41 }
  0x6a   :  { %v841_v23 = vpop.eup %840  ;;  %v208_v50 = vmul.f32 0.6931472, %v839_v9  ;;  %v264_v2 = vadd.f32 1.0, %v263_v55  ;;  %v273_v27 = vadd.f32 1.0, %v272_v38  ;;  %856 = vpow2.f32 %v192_v46  ;;  %v1360_v46 = vld [vmem:[#allocation9 + $0x68] sm:$0xff] }
  0x6b   :  { %v217_v28 = vmul.f32 0.6931472, %v841_v23  ;;  %v843_v33 = vpop.eup %842  ;;  %vm1279_vm6 = vcmp.lt.f32.partialorder %v257_v37, 0.0004427343  ;;  %vm1288_vm7 = vcmp.lt.f32.partialorder %v266_v56, 0.0004427343 }
  0x6c   :  { %v214_v34 = vsel %vm1227_vm1, %v211_v58, %v208_v50  ;;  %v845_v63 = vpop.eup %844  ;;  %v226_v44 = vmul.f32 0.6931472, %v843_v33  ;;  %v367_v58 = vld [vmem:[#allocation7 + $0x8] sm:$0xff]  ;;  %v369_v50 = vld [vmem:[#allocation7 + $0x18] sm:$0xff]  ;;  %v134_v55 = vmax.f32 %v1194_v42, 0.0  ;;  %vm637_vm1 = vcmask 1040384  }
  0x6d   :  { %v223_v39 = vsel %vm1235_vm2, %v220_v12, %v217_v28  ;;  %v350_v8 = vadd.f32 %v214_v34, %v126_v51  ;;  %v235_v43 = vmul.f32 0.6931472, %v845_v63  ;;  %v847_v57 = vpop.eup %846  ;;  %v275_v51 = vand.u32 2147483647, %v1232_v47  ;;  %v368_v12 = vld [vmem:[#allocation7 + $0x10] sm:$0xff] }
  0x6e   :  { %v351_v45 = vadd.f32 %v223_v39, %v127_v52  ;;  %v232_v59 = vsel %vm1240_vm3, %v229_v24, %v226_v44  ;;  %v849_v7 = vpop.eup %848  ;;  %v244_v13 = vmul.f32 0.6931472, %v847_v57  ;;  %v521_v63 = vmul.f32 %v117_v31, %v117_v31  ;;  %v1309_v39 = vld [vmem:[#allocation9 + $0x58] sm:$0xff] }
  0x6f   :  { %v382_v62 = vmul.f32 %v350_v8, %v1156_v4  ;;  %v241_v3 = vsel %vm1244_vm4, %v238_v29, %v235_v43  ;;  %v352_v52 = vadd.f32 %v232_v59, %v128_v53  ;;  %v253_v24 = vmul.f32 0.6931472, %v849_v7  ;;  %v370_v43 = vld [vmem:[#allocation7 + $0x20] sm:$0xff] }
  0x70   :  { %v383_v36 = vmul.f32 %v351_v45, %v1158_v5  ;;  %v1276_v4 = vadd.f32 %v241_v3, %v129_v60  ;;  %v851_v10 = vpop.eup %850  ;;  %v250_v11 = vsel %vm1248_vm5, %v247_v35, %v244_v13  ;;  %v265_v60 = vmul.f32 %v1225_v41, %v264_v2  ;;  %v1303_v35 = vld [vmem:[#allocation9 + $0x50] sm:$0xff] }
  0x71   :  { %v398_v9 = vadd.f32 %v382_v62, %v366_v49  ;;  %v384_v5 = vmul.f32 %v352_v52, %v1172_v18  ;;  %v853_v25 = vpop.eup %852  ;;  %v274_v29 = vmul.f32 %v1232_v47, %v273_v27  ;;  %vm1293_vm8 = vcmp.lt.f32.partialorder %v275_v51, 0.0004427343  ;;  %v372_v51 = vld [vmem:[#allocation7 + $0x30] sm:$0xff] }
  0x72   :  { %v399_v23 = vadd.f32 %v383_v36, %v367_v58  ;;  %v385_v53 = vmul.f32 %v1276_v4, %v1184_v30  ;;  %v259_v30 = vsel %vm1279_vm6, %v256_v22, %v253_v24  ;;  %v1301_v41 = vadd.f32 %v250_v11, %v130_v61  ;;  %v371_v22 = vld [vmem:[#allocation7 + $0x28] sm:$0xff]  ;;  %v373_v36 = vld [vmem:[#allocation7 + $0x38] sm:$0xff] }
  0x73   :  { %v400_v28 = vadd.f32 %v384_v5, %v368_v12  ;;  %v262_v34 = vmul.f32 0.6931472, %v851_v10  ;;  %v489_v37 = vadd.f32 %v351_v45, %v350_v8  ;;  %v1307_v47 = vadd.f32 %v259_v30, %v131_v1  ;;  %v1311_v44 = vpop.eup %854 }
  0x74   :  { %v774_v18 = vpack.c.bf16 %v399_v23, %v398_v9  ;;  %v401_v33 = vadd.f32 %v385_v53, %v369_v50  ;;  %v271_v38 = vmul.f32 0.6931472, %v853_v25  ;;  %v560_v49 = vmul.f32 %v398_v9, %v398_v9  ;;  %v1335_v26 = vpop.eup %856  ;;  %v1345_v9 = vld [vmem:[#allocation10 + $0x40] sm:$0xff]  ;;  %v1355_v53 = vld [vmem:[#allocation10 + $0x48] sm:$0xff]  ;;  %v1362_v25 = vld [vmem:[#allocation9 + $0x70] sm:$0xff] }
  0x75   :  { %v561_v19 = vmul.f32 %v399_v23, %v399_v23  ;;  %v386_v8 = vmul.f32 %v1301_v41, %v1192_v40  ;;  %v387_v20 = vmul.f32 %v1307_v47, %v1204_v54  ;;  %v268_v1 = vsel %vm1288_vm7, %v265_v60, %v262_v34  ;;  %v1358_v60 = vld [vmem:[#allocation9 + $0x60] sm:$0xff]  ;;  %v1369_v34 = vld [vmem:[#allocation9 + $0x78] sm:$0xff] }
  0x76   :  { %775 = vmatpush3.bf16.msra.mxu0 %v774_v18  ;;  %v777_v61 = vpack.c.bf16 %v401_v33, %v400_v28  ;;  %v277_v45 = vsel %vm1293_vm8, %v274_v29, %v271_v38  ;;  %v152_v56 = vand.u32 2147483647, %v1303_v35  ;;  %v1325_v57 = vadd.f32 %v268_v1, %v132_v6 }
  0x77   :  { %776 = vmatprep.subr.bf16.mxu0 %v1038_v0  ;;  %v1329_v58 = vadd.f32 %v277_v45, %v133_v17  ;;  %v535_v40 = vadd.f32 %v1215_v16, %v1220_v21  ;;  %v153_v54 = vand.u32 2147483647, %v1309_v39  ;;  %v490_v62 = vadd.f32 %v489_v37, %v352_v52 }
  0x78   :  { %v402_v59 = vadd.f32 %v386_v8, %v370_v43  ;;  %v403_v2 = vadd.f32 %v387_v20, %v371_v22  ;;  %v278_v3 = vadd.f32 1.0, %v1311_v44  ;;  %v576_v6 = vadd.f32 %v561_v19, %v560_v49 }
  0x79   :  { %v562_v27 = vmul.f32 %v400_v28, %v400_v28  ;;  %v388_v32 = vmul.f32 %v1325_v57, %v1213_v14  ;;  %v389_v16 = vmul.f32 %v1329_v58, %v117_v31  ;;  %v168_v21 = vsub.f32 0.0, %v152_v56 }
  0x7a   :  { %778 = vmatpush3.bf16.msra.mxu0 %v777_v61  ;;  %v780_v17 = vpack.c.bf16 %v403_v2, %v402_v59  ;;  %858 = vlog2.f32 %v278_v3  ;;  %v281_v12 = vmul.f32 -0.5, %v1311_v44  ;;  %v169_v13 = vsub.f32 0.0, %v153_v54  ;;  %v1426_v61 = vld [vmem:[#allocation10 + $0x60] sm:$0xff] }
  0x7b   :  { %779 = vmatprep.subr.bf16.mxu0 %v1038_v0  ;;  %v1341_v52 = vadd.f32 %v388_v32, %v372_v51  ;;  %v1343_v7 = vadd.f32 %v389_v16, %v373_v36  ;;  %v536_v23 = vadd.f32 %v535_v40, %v521_v63  ;;  %v287_v50 = vadd.f32 1.0, %v1335_v26  ;;  %v1387_v32 = vld [vmem:[#allocation10 + $0x50] sm:$0xff] }
  0x7c   :  { %v522_v14 = vmul.f32 %v1345_v9, %v1345_v9  ;;  %v491_v5 = vadd.f32 %v490_v62, %v1276_v4  ;;  %v563_v24 = vmul.f32 %v401_v33, %v401_v33  ;;  %v577_v15 = vadd.f32 %v576_v6, %v562_v27 }
  0x7d   :  { %v783_v10 = vpack.c.bf16 %v1343_v7, %v1341_v52  ;;  %v284_v11 = vand.u32 2147483647, %v1311_v44  ;;  %860 = vlog2.f32 %v287_v50  ;;  %v282_v18 = vadd.f32 1.0, %v281_v12 }
  0x7e   :  { %781 = vmatpush3.bf16.msra.mxu0 %v780_v17  ;;  %v290_v4 = vmul.f32 -0.5, %v1335_v26  ;;  %v194_v28 = vmul.f32 1.442695, %v168_v21  ;;  %v196_v29 = vmul.f32 1.442695, %v169_v13  ;;  %v135_v33 = vmax.f32 %v1198_v48, 0.0 }
  0x7f   :  { %782 = vmatprep.subr.bf16.mxu0 %v1038_v0  ;;  %v523_v30 = vmul.f32 %v1355_v53, %v1355_v53  ;;  %v537_v31 = vadd.f32 %v536_v23, %v522_v14  ;;  %v578_v37 = vadd.f32 %v577_v15, %v563_v24  ;;  %v492_v38 = vadd.f32 %v491_v5, %v1301_v41 }
  0x80   :  { %v564_v63 = vmul.f32 %v402_v59, %v402_v59  ;;  %862 = vpow2.f32 %v194_v28  ;;  %v154_v49 = vand.u32 2147483647, %v1358_v60  ;;  %v155_v42 = vand.u32 2147483647, %v1360_v46  ;;  %v374_v28 = vld [vmem:[#allocation7 + $0x40] sm:$0xff] }
  0x81   :  { %864 = vpow2.f32 %v196_v29  ;;  %v156_v48 = vand.u32 2147483647, %v1362_v25  ;;  %v283_v19 = vmul.f32 %v1311_v44, %v282_v18  ;;  %vm1377_vm9 = vcmp.lt.f32.partialorder %v284_v11, 0.0004427343  ;;  %v1408_v11 = vld [vmem:[#allocation10 + $0x58] sm:$0xff]  ;;  %v375_v29 = vld [vmem:[#allocation7 + $0x48] sm:$0xff] }
  0x82   :  { %784 = vmatpush3.bf16.msra.mxu0 %v783_v10  ;;  %v291_v43 = vadd.f32 1.0, %v290_v4  ;;  %v157_v41 = vand.u32 2147483647, %v1369_v34  ;;  %v293_v8 = vand.u32 2147483647, %v1335_v26  ;;  %v170_v20 = vsub.f32 0.0, %v154_v49 }
  0x83   :  { %785 = vmatprep.subr.bf16.mxu0 %v1038_v0  ;;  %v171_v1 = vsub.f32 0.0, %v155_v42  ;;  %v172_v45 = vsub.f32 0.0, %v156_v48  ;;  %v565_v56 = vmul.f32 %v403_v2, %v403_v2  ;;  %v579_v40 = vadd.f32 %v578_v37, %v564_v63 }
  0x84   :  { %v859_v22 = vpop.eup %858  ;;  %v173_v62 = vsub.f32 0.0, %v157_v41  ;;  %v538_v59 = vadd.f32 %v537_v31, %v523_v30  ;;  %v198_v51 = vmul.f32 1.442695, %v170_v20  ;;  %v493_v3 = vadd.f32 %v492_v38, %v1307_v47 }
  0x85   :  { %v280_v54 = vmul.f32 0.6931472, %v859_v22  ;;  %v200_v44 = vmul.f32 1.442695, %v171_v1  ;;  %v202_v36 = vmul.f32 1.442695, %v172_v45  ;;  %v292_v27 = vmul.f32 %v1335_v26, %v291_v43 }
  0x86   :  { %v204_v16 = vmul.f32 1.442695, %v173_v62  ;;  %vm1389_vm10 = vcmp.lt.f32.partialorder %v293_v8, 0.0004427343  ;;  %v524_v12 = vmul.f32 %v1387_v32, %v1387_v32  ;;  %866 = vpow2.f32 %v198_v51  ;;  %v1433_v45 = vld [vmem:[#allocation10 + $0x70] sm:$0xff] }
  0x87   :  { %v286_v6 = vsel %vm1377_vm9, %v283_v19, %v280_v54  ;;  %v861_v17 = vpop.eup %860  ;;  %v580_v13 = vadd.f32 %v579_v40, %v565_v56  ;;  %v566_v47 = vmul.f32 %v1341_v52, %v1341_v52  ;;  %868 = vpow2.f32 %v200_v44  ;;  %v1436_v40 = vld [vmem:[#allocation10 + $0x68] sm:$0xff] }
  0x88   :  { %v358_v21 = vadd.f32 %v286_v6, %v134_v55  ;;  %v289_v23 = vmul.f32 0.6931472, %v861_v17  ;;  %870 = vpow2.f32 %v202_v36  ;;  %v494_v50 = vadd.f32 %v493_v3, %v1325_v57  ;;  %v1413_v57 = vld [vmem:[%s1571_s5] sm:$0x1] }
  0x89   :  { %v136_v5 = vmax.f32 %v1303_v35, 0.0  ;;  %872 = vpow2.f32 %v204_v16  ;;  %v567_v15 = vmul.f32 %v1343_v7, %v1343_v7  ;;  %v581_v4 = vadd.f32 %v580_v13, %v566_v47 }
  0x8a   :  { %v863_v26 = vpop.eup %862  ;;  %v295_v14 = vsel %vm1389_vm10, %v292_v27, %v289_v23  ;;  %v390_v52 = vmul.f32 %v358_v21, %v1345_v9  ;;  %v525_v7 = vmul.f32 %v1408_v11, %v1408_v11  ;;  %v137_v30 = vmax.f32 %v1309_v39, 0.0 }
  0x8b   :  { %v1401_v24 = vpop.eup %864  ;;  %v1405_v10 = vadd.f32 %v295_v14, %v135_v33  ;;  %v296_v18 = vadd.f32 1.0, %v863_v26  ;;  %v539_v33 = vadd.f32 %v538_v59, %v524_v12  ;;  %v299_v31 = vmul.f32 -0.5, %v863_v26 }
  0x8c   :  { %v305_v55 = vadd.f32 1.0, %v1401_v24  ;;  %v495_v37 = vadd.f32 %v494_v50, %v1329_v58  ;;  %v138_v38 = vmax.f32 %v1358_v60, 0.0  ;;  %v610_v63 = vand.u32 2147483647, %v1413_v57 }
  0x8d   :  { %v391_v9 = vmul.f32 %v1405_v10, %v1355_v53  ;;  %874 = vlog2.f32 %v296_v18  ;;  %v406_v49 = vadd.f32 %v390_v52, %v374_v28  ;;  %v308_v48 = vmul.f32 -0.5, %v1401_v24 }
  0x8e   :  { %876 = vlog2.f32 %v305_v55  ;;  %v139_v19 = vmax.f32 %v1360_v46, 0.0  ;;  %v582_v53 = vadd.f32 %v581_v4, %v567_v15  ;;  %v140_v43 = vmax.f32 %v1362_v25, 0.0 }
  0x8f   :  { %v407_v42 = vadd.f32 %v391_v9, %v375_v29  ;;  %v526_v41 = vmul.f32 %v1426_v61, %v1426_v61  ;;  %v540_v58 = vadd.f32 %v539_v33, %v525_v7  ;;  %v300_v20 = vadd.f32 1.0, %v299_v31 }
  0x90   :  { %v1431_v22 = vpop.eup %866  ;;  %v302_v1 = vand.u32 2147483647, %v863_v26  ;;  %v141_v56 = vmax.f32 %v1369_v34, 0.0  ;;  %v527_v59 = vmul.f32 %v1436_v40, %v1436_v40  ;;  %v1443_v51 = vmul.f32 %v1433_v45, %v1433_v45 }
  0x91   :  { %v786_v8 = vpack.c.bf16 %v407_v42, %v406_v49  ;;  %v869_v54 = vpop.eup %868  ;;  %v314_v62 = vadd.f32 1.0, %v1431_v22  ;;  %v611_v44 = vsub.f32 0.0, %v610_v63  ;;  %v568_v3 = vmul.f32 %v406_v49, %v406_v49 }
  0x92   :  { %v871_v36 = vpop.eup %870  ;;  %v309_v6 = vadd.f32 1.0, %v308_v48  ;;  %v311_v27 = vand.u32 2147483647, %v1401_v24  ;;  %v323_v16 = vadd.f32 1.0, %v869_v54  ;;  %v496_v2 = vadd.f32 %v495_v37, %v358_v21 }
  0x93   :  { %787 = vmatpush3.bf16.msra.mxu0 %v786_v8  ;;  %v1446_v17 = vpop.eup %872  ;;  %878 = vlog2.f32 %v314_v62  ;;  %v332_v12 = vadd.f32 1.0, %v871_v36  ;;  %v541_v13 = vadd.f32 %v540_v58, %v526_v41  ;;  %v301_v47 = vmul.f32 %v863_v26, %v300_v20  ;;  %v376_v20 = vld [vmem:[#allocation7 + $0x50] sm:$0xff] }
  0x94   :  { %788 = vmatprep.subr.bf16.mxu0 %v1038_v0  ;;  %vm1449_vm11 = vcmp.lt.f32.partialorder %v302_v1, 0.0004427343  ;;  %v317_v50 = vmul.f32 -0.5, %v1431_v22  ;;  %880 = vlog2.f32 %v323_v16  ;;  %v326_v14 = vmul.f32 -0.5, %v869_v54 }
  0x95   :  { %882 = vlog2.f32 %v332_v12  ;;  %v341_v15 = vadd.f32 1.0, %v1446_v17  ;;  %v612_v52 = vmul.f32 1.442695, %v611_v44  ;;  %v583_v21 = vadd.f32 %v582_v53, %v568_v3  ;;  %v377_v44 = vld [vmem:[#allocation7 + $0x58] sm:$0xff] }
  0x96   :  { %v310_v4 = vmul.f32 %v1401_v24, %v309_v6  ;;  %vm1456_vm12 = vcmp.lt.f32.partialorder %v311_v27, 0.0004427343  ;;  %v335_v26 = vmul.f32 -0.5, %v871_v36  ;;  %v569_v55 = vmul.f32 %v407_v42, %v407_v42 }
  0x97   :  { %v875_v18 = vpop.eup %874  ;;  %884 = vlog2.f32 %v341_v15  ;;  %v497_v33 = vadd.f32 %v496_v2, %v1405_v10  ;;  %v318_v31 = vadd.f32 1.0, %v317_v50  ;;  %v320_v37 = vand.u32 2147483647, %v1431_v22 }
  0x98   :  { %v877_v29 = vpop.eup %876  ;;  %v298_v7 = vmul.f32 0.6931472, %v875_v18  ;;  %v344_v63 = vmul.f32 -0.5, %v1446_v17  ;;  %v327_v49 = vadd.f32 1.0, %v326_v14  ;;  %v329_v48 = vand.u32 2147483647, %v869_v54 }
  0x99   :  { %v307_v9 = vmul.f32 0.6931472, %v877_v29  ;;  %886 = vpow2.f32 %v612_v52  ;;  %v336_v41 = vadd.f32 1.0, %v335_v26  ;;  %v338_v10 = vand.u32 2147483647, %v871_v36  ;;  %v125_v29 = vld [vmem:[#allocation10 + $0x78] sm:$0xff] }
  0x9a   :  { %v304_v24 = vsel %vm1449_vm11, %v301_v47, %v298_v7  ;;  %v584_v58 = vadd.f32 %v583_v21, %v569_v55  ;;  %v347_v1 = vand.u32 2147483647, %v1446_v17  ;;  %v542_v62 = vadd.f32 %v541_v13, %v527_v59 }
  0x9b   :  { %v313_v53 = vsel %vm1456_vm12, %v310_v4, %v307_v9  ;;  %v360_v42 = vadd.f32 %v304_v24, %v136_v5  ;;  %v319_v6 = vmul.f32 %v1431_v22, %v318_v31  ;;  %v345_v27 = vadd.f32 1.0, %v344_v63  ;;  %v378_v9 = vld [vmem:[#allocation7 + $0x60] sm:$0xff]  ;;  %v379_v24 = vld [vmem:[#allocation7 + $0x68] sm:$0xff] }
  0x9c   :  { %v361_v8 = vadd.f32 %v313_v53, %v137_v30  ;;  %vm1475_vm13 = vcmp.lt.f32.partialorder %v320_v37, 0.0004427343  ;;  %v328_v39 = vmul.f32 %v869_v54, %v327_v49  ;;  %vm1479_vm14 = vcmp.lt.f32.partialorder %v329_v48, 0.0004427343 }
  0x9d   :  { %v392_v3 = vmul.f32 %v360_v42, %v1387_v32  ;;  %v498_v16 = vadd.f32 %v497_v33, %v360_v42  ;;  %v879_v2 = vpop.eup %878  ;;  %v337_v32 = vmul.f32 %v871_v36, %v336_v41  ;;  %vm1483_vm15 = vcmp.lt.f32.partialorder %v338_v10, 0.0004427343 }
  0x9e   :  { %v393_v35 = vmul.f32 %v361_v8, %v1408_v11  ;;  %v881_v59 = vpop.eup %880  ;;  %v316_v13 = vmul.f32 0.6931472, %v879_v2  ;;  %vm1487_vm0 = vcmp.lt.f32.partialorder %v347_v1, 0.0004427343  ;;  %v346_v18 = vmul.f32 %v1446_v17, %v345_v27 }
  0x9f   :  { %v408_v12 = vadd.f32 %v392_v3, %v376_v20  ;;  %v883_v47 = vpop.eup %882  ;;  %v325_v11 = vmul.f32 0.6931472, %v881_v59  ;;  %v499_v54 = vadd.f32 %v498_v16, %v361_v8 }
  0xa0   :  { %v409_v23 = vadd.f32 %v393_v35, %v377_v44  ;;  %v322_v15 = vsel %vm1475_vm13, %v319_v6, %v316_v13  ;;  %v334_v52 = vmul.f32 0.6931472, %v883_v47 }
  0xa1   :  { %v570_v14 = vmul.f32 %v408_v12, %v408_v12  ;;  %v885_v36 = vpop.eup %884  ;;  %v331_v28 = vsel %vm1479_vm14, %v328_v39, %v325_v11  ;;  %v362_v26 = vadd.f32 %v322_v15, %v138_v38  ;;  %v529_v38 = vmul.f32 %v125_v29, %v125_v29 }
  0xa2   :  { %v789_v21 = vpack.c.bf16 %v409_v23, %v408_v12  ;;  %v571_v4 = vmul.f32 %v409_v23, %v409_v23  ;;  %v340_v55 = vsel %vm1483_vm15, %v337_v32, %v334_v52  ;;  %v343_v7 = vmul.f32 0.6931472, %v885_v36  ;;  %v415_v12 = vld [vmem:[#allocation3] sm:$0xff] }
  0xa3   :  { %v363_v33 = vadd.f32 %v331_v28, %v139_v19  ;;  %v585_v31 = vadd.f32 %v584_v58, %v570_v14  ;;  %v887_v17 = vpop.eup %886  ;;  %v364_v37 = vadd.f32 %v340_v55, %v140_v43  ;;  %v500_v63 = vadd.f32 %v499_v54, %v362_v26  ;;  %v380_v19 = vld [vmem:[#allocation7 + $0x70] sm:$0xff]  ;;  %v381_v58 = vld [vmem:[#allocation7 + $0x78] sm:$0xff] }
  0xa4   :  { %790 = vmatpush3.bf16.msra.mxu0 %v789_v21  ;;  %v394_v60 = vmul.f32 %v362_v26, %v1426_v61  ;;  %v349_v49 = vsel %vm1487_vm0, %v346_v18, %v343_v7  ;;  %v614_v53 = vadd.f32 1.0, %v887_v17  ;;  %v543_v61 = vadd.f32 %v542_v62, %v1443_v51  ;;  %v624_v54 = vld [vmem:[%s1570_s4] sm:$0x1] }
  0xa5   :  { %791 = vmatprep.subr.bf16.mxu0 %v1038_v0  ;;  %v395_v46 = vmul.f32 %v363_v33, %v1436_v40  ;;  %v586_v48 = vadd.f32 %v585_v31, %v571_v4  ;;  %v365_v42 = vadd.f32 %v349_v49, %v141_v56  ;;  %v396_v25 = vmul.f32 %v364_v37, %v1433_v45  ;;  %v608_v45 = vld [vmem:[%s1572_s6] sm:$0x1] }
  0xa6   :  { %v501_v43 = vadd.f32 %v500_v63, %v363_v33  ;;  %v410_v41 = vadd.f32 %v394_v60, %v378_v9  ;;  %888 = vlog2.f32 %v614_v53  ;;  %v617_v8 = vmul.f32 -0.5, %v887_v17 }
  0xa7   :  { %v411_v10 = vadd.f32 %v395_v46, %v379_v24  ;;  %v397_v20 = vmul.f32 %v365_v42, %v125_v29  ;;  %v412_v44 = vadd.f32 %v396_v25, %v380_v19  ;;  %v544_v2 = vadd.f32 %v543_v61, %v529_v38 }
  0xa8   :  { %v502_v1 = vadd.f32 %v501_v43, %v364_v37  ;;  %v572_v40 = vmul.f32 %v410_v41, %v410_v41  ;;  %v618_v5 = vadd.f32 1.0, %v617_v8  ;;  %v649_v39 = vmul.f32 %v608_v45, %v608_v45 }
  0xa9   :  { %v792_v3 = vpack.c.bf16 %v411_v10, %v410_v41  ;;  %v573_v6 = vmul.f32 %v411_v10, %v411_v10  ;;  %v413_v16 = vadd.f32 %v397_v20, %v381_v58  ;;  %v574_v34 = vmul.f32 %v412_v44, %v412_v44 }
  0xaa   :  { %v503_v27 = vadd.f32 %v502_v1, %v365_v42  ;;  %v587_v56 = vadd.f32 %v586_v48, %v572_v40  ;;  %v620_v30 = vand.u32 2147483647, %v887_v17  ;;  %v619_v32 = vmul.f32 %v887_v17, %v618_v5 }
  0xab   :  { %793 = vmatpush3.bf16.msra.mxu0 %v792_v3  ;;  %v795_v51 = vpack.c.bf16 %v413_v16, %v412_v44  ;;  %v575_v62 = vmul.f32 %v413_v16, %v413_v16  ;;  %v650_v47 = vsel %vm637_vm1, %v649_v39, 0.0  ;;  %v609_v23 = vmax.f32 %v1413_v57, 0.0 }
  0xac   :  { %504 = vadd.xlane.f32.xlu0 %v503_v27  ;;  %794 = vmatprep.subr.bf16.mxu0 %v1038_v0  ;;  %v588_v35 = vadd.f32 %v587_v56, %v573_v6  ;;  %vm621_vm2 = vcmp.lt.f32.partialorder %v620_v30, 0.0004427343 }
  0xae   :  { %v589_v59 = vadd.f32 %v588_v35, %v574_v34 }
  0xaf   :  { %796 = vmatpush3.bf16.msra.mxu0 %v795_v51  ;;  %v629_v51 = vlaneseq }
  0xb0   :  { %545 = vadd.xlane.f32.xlu0 %v544_v2  ;;  %v590_v13 = vadd.f32 %v589_v59, %v575_v62  ;;  %v889_v22 = vpop.eup %888 }
  0xb1   :  { %v616_v0 = vmul.f32 0.6931472, %v889_v22  ;;  %v630_v62 = vshrl.u32 %v629_v51, 7 }
  0xb2   :  { %591 = vadd.xlane.f32.xlu1 %v590_v13  ;;  %771 = vmatmul.mubr.f32.vlgmr.msra.gmra.mrb[0].mxu0 %v415_v12 }
  0xb3   :  { %v622_v11 = vsel %vm621_vm2, %v619_v32, %v616_v0  ;;  %v631_v35 = vsub.s32 0, %v630_v62 }
  0xb4   :  { %651 = vadd.xlane.f32.xlu0 %v650_v47  ;;  %v623_v50 = vadd.f32 %v622_v11, %v609_v23 }
  0xb6   :  { %v625_v14 = vmul.f32 %v623_v50, %v608_v45  ;;  %v638_v15 = vsel %vm637_vm1, %v623_v50, 0.0 }
  0xb7   :  { %639 = vadd.xlane.f32.xlu1 %v638_v15 }
  0xb8   :  { %v626_v52 = vadd.f32 %v625_v14, %v624_v54 }
  0xba   :  { %v665_v18 = vmul.f32 %v626_v52, %v626_v52  ;;  %v632_v5 = vrot.slane %v626_v52, %v631_v35 }
  0xbc   :  { %v666_v36 = vsel %vm637_vm1, %v665_v18, 0.0 }
  0xbd   :  { %667 = vadd.xlane.f32.xlu1 %v666_v36 }
 0x139   :  { %v505_v57 = vpop.xlane.xlu0 %504 }
 0x13a   :  { %v506_v21 = vrot.slane %v505_v57, 4 }
 0x13c   :  { %v507_v4 = vadd.f32 %v506_v21, %v505_v57 }
 0x13d   :  { %v546_v28 = vpop.xlane.xlu0 %545 }
 0x13e   :  { %v508_v26 = vrot.slane %v507_v4, 2  ;;  %v547_v29 = vrot.slane %v546_v28, 4 }
 0x13f   :  { %v592_v55 = vpop.xlane.xlu1 %591 }
 0x140   :  { %v548_v7 = vadd.f32 %v547_v29, %v546_v28  ;;  %v593_v33 = vrot.slane %v592_v55, 4  ;;  %v509_v9 = vadd.f32 %v508_v26, %v507_v4 }
 0x141   :  { %v652_v31 = vpop.xlane.xlu0 %651 }
 0x142   :  { %v549_v17 = vrot.slane %v548_v7, 2  ;;  %v594_v37 = vadd.f32 %v593_v33, %v592_v55  ;;  %v653_v63 = vrot.slane %v652_v31, 4  ;;  %v510_v24 = vrot.slane %v509_v9, 1 }
 0x144   :  { %v595_v60 = vrot.slane %v594_v37, 2  ;;  %v654_v38 = vadd.f32 %v653_v63, %v652_v31  ;;  %v511_v49 = vadd.f32 %v510_v24, %v509_v9  ;;  %v550_v46 = vadd.f32 %v549_v17, %v548_v7  ;;  %v640_v19 = vpop.xlane.xlu1 %639 }
 0x145   :  { %v641_v53 = vrot.slane %v640_v19, 4 }
 0x146   :  { %v655_v48 = vrot.slane %v654_v38, 2  ;;  %797 = vpush %v511_v49  ;;  %v551_v42 = vrot.slane %v550_v46, 1  ;;  %v596_v25 = vadd.f32 %v595_v60, %v594_v37 }
 0x147   :  { %v642_v43 = vadd.f32 %v641_v53, %v640_v19 }
 0x148   :  { %v552_v41 = vadd.f32 %v551_v42, %v550_v46  ;;  %v597_v10 = vrot.slane %v596_v25, 1  ;;  %v656_v61 = vadd.f32 %v655_v48, %v654_v38 }
 0x149   :  { %v643_v58 = vrot.slane %v642_v43, 2 }
 0x14a   :  { %799 = vpush %v552_v41  ;;  %v598_v8 = vadd.f32 %v597_v10, %v596_v25  ;;  %v668_v20 = vpop.xlane.xlu1 %667  ;;  %v657_v40 = vrot.slane %v656_v61, 1 }
 0x14b   :  { %v669_v1 = vrot.slane %v668_v20, 4  ;;  %v644_v44 = vadd.f32 %v643_v58, %v642_v43 }
 0x14c   :  { %801 = vpush %v598_v8  ;;  %v658_v34 = vadd.f32 %v657_v40, %v656_v61 }
 0x14d   :  { %v670_v3 = vadd.f32 %v669_v1, %v668_v20  ;;  %v645_v6 = vrot.slane %v644_v44, 1 }
 0x14f   :  { %v671_v27 = vrot.slane %v670_v3, 2  ;;  %v646_v16 = vadd.f32 %v645_v6, %v644_v44 }
 0x151   :  { %v672_v56 = vadd.f32 %v671_v27, %v670_v3  ;;  %803 = vpush %v646_v16 }
 0x152   :  { %805 = vpush %v658_v34 }
 0x153   :  { %v673_v45 = vrot.slane %v672_v56, 1 }
 0x155   :  { %v674_v2 = vadd.f32 %v673_v45, %v672_v56 }
 0x157   :  { %807 = vpush %v674_v2 }
 0x177   :  { %s798_s4 = spop %797 }
 0x178   :  { %s513_s18 = ssub.f32 0.0, %s798_s4 }
 0x17b   :  { %s800_s16 = spop %799 }
 0x17c   :  { %s554_s17 = smul.f32 0.5, %s800_s16 }
 0x17d   :  { %s1526_s22 = spop %801 }
 0x17e   :  { %s1524_s21 = ssub.f32 %s513_s18, %s554_s17  ;;  %s600_s29 = smul.f32 -50.0, %s1526_s22 }
 0x182   :  { %s804_s23 = spop %803 }
 0x183   :  { %s648_s25 = ssub.f32 0.0, %s804_s23  ;;  %s806_s0 = spop %805 }
 0x184   :  { %s660_s24 = smul.f32 0.5, %s806_s0 }
 0x185   :  { %v482_v39 = vpop.f32.mrb[0].mxu0 }
 0x186   :  { %v634_v30 = vadd.f32 %v632_v5, %v482_v39  ;;  %v772_v59 = vpop.f32.mrb[1].mxu0  ;;  %s661_s30 = ssub.f32 %s648_s25, %s660_s24 }
 0x188   :  { %635 = vst [vmem:[#allocation12] sm:$0xff] %v634_v30  ;;  %s662_s11 = sadd.f32 %s661_s30, %s1524_s21  ;;  %s808_s12 = spop %807 }
 0x189   :  { %s676_s13 = smul.f32 -50.0, %s808_s12 }
 0x18a   :  { %989 = shalt.err (!%p986_p8)
}
 0x18b   :  { %s990_s2 = scalar_lea.hbm %s1573_s7, 128 }
 0x18c   :  { %p991_p9 = scmp.ne.s32.totalorder %s1573_s7, %s990_s2  ;;  %p994_p10 = scmp.lt.u32.totalorder %s990_s2, %s1573_s7 }
 0x18e   :  { %p996_p11 = pnand %p994_p10, %p991_p9 }
 0x190   :  { %999 = shalt.err (!%p996_p11)
}
 0x191   :  { %688 = dma.vmem_to_hbm [thread:$0]  %s686_s28, 128, %s1573_s7, [#allocation5]  }
 0x192   :  { %s677_s15 = sadd.f32 %s676_s13, %s600_s29  ;;  %s1000_s17 = scalar_lea.hbm %s1574_s8, 16 }
 0x193   :  { %663 = sst [smem:[#allocation13]] %s662_s11  ;;  %p1001_p12 = scmp.ne.s32.totalorder %s1574_s8, %s1000_s17 }
 0x194   :  { %p1004_p13 = scmp.lt.u32.totalorder %s1000_s17, %s1574_s8 }
 0x196   :  { %p1006_p0 = pnand %p1004_p13, %p1001_p12 }
 0x198   :  { %1009 = shalt.err (!%p1006_p0)
}
 0x199   :  { %s1042_s25 = smov [#allocation13]   ;;  %678 = sst [smem:[#allocation14]] %s677_s15 }
 0x19a   :  { %696 = dma.smem_to_hbm %s1042_s25, 16, %s1574_s8, [#allocation6]  }
 0x19b   :  { %s1010_s28 = scalar_lea.hbm %s1575_s9, 16 }
 0x19c   :  { %p1011_p1 = scmp.ne.s32.totalorder %s1575_s9, %s1010_s28  ;;  %p1014_p2 = scmp.lt.u32.totalorder %s1010_s28, %s1575_s9 }
 0x19e   :  { %p1016_p3 = pnand %p1014_p2, %p1011_p1 }
 0x1a0   :  { %1019 = shalt.err (!%p1016_p3)
}
 0x1a1   :  { %s1043_s13 = smov [#allocation14]  }
 0x1a2   :  { %704 = dma.smem_to_hbm %s1043_s13, 16, %s1575_s9, [#allocation15]  }
 0x1a3   :  { %1026 = dma.done.wait [#allocation5], 128  }
 0x1a4   :  { %1027 = vsyncadd [#allocation5], 4294967168 }
 0x1a5   :  { %1028 = dma.done.wait [#allocation6], 16  }
 0x1a6   :  { %1029 = vsyncadd [#allocation6], 4294967280 }
 0x1a7   :  { %1030 = dma.done.wait [#allocation15], 16  }
 0x1a8   :  { %1031 = vsyncadd [#allocation15], 4294967280 }
 0x1a9   :  { %714 = sfence }
 0x1aa   :  { %715 = vsyncpa [#allocation4], 1 }
 0x1ab   :  { %716 = vsyncpa [#allocation8], 1 }
 0x1ac   :  { %717 = vsyncpa [#allocation11], 1 }
 0x1ad   :  { %718 = vsyncpa [#allocation5], 1 }
 0x1ae   :  { %719 = vsyncpa [#allocation6], 1 }
 0x1af   :  { %720 = vsyncpa [#allocation15], 1 }

</bundles_post_ra>
